<compile_context>
chip_gen: v7x
topology: tpu7x:2x2x1
jax: 0.10.0
libtpu: 0.0.40
codegen_flags: <defaults>
</compile_context>

<pallas_src>
import functools

import jax
import jax.numpy as jnp
from jax import lax
from jax.experimental import pallas as pl
from jax.experimental.pallas import tpu as pltpu


def _round_up(x, m):
    return ((x + m - 1) // m) * m


def _pick_tf(F, target):
    """Largest lane-aligned (multiple of 128) divisor of F that is <= target."""
    target = max(1, min(target, F))
    d = (target // 128) * 128
    while d >= 128:
        if F % d == 0:
            return d
        d -= 128
    for d in range(target, 0, -1):
        if F % d == 0:
            return d
    return F


def _chip_config():
    """Per-generation tile defaults + physical VMEM capacity."""
    kind = ""
    try:
        kind = jax.devices()[0].device_kind.lower()
    except Exception:
        pass
    vmem_cap = 64 * 1024 * 1024
    try:
        vmem_cap = int(getattr(pltpu.get_tpu_info(), "vmem_capacity_bytes", vmem_cap))
    except Exception:
        pass
    if "v5" in kind:
        # v5e: already near the roofline knee at tm=256; spend VMEM on deeper
        # weight buffering instead of bigger tiles.
        return dict(tm=256, tf=512, wbuf=3, vmem_cap=vmem_cap)
    if "v7" in kind:
        # v7x: 64 MiB VMEM -> shrink tf first, keep tm high for arithmetic intensity.
        return dict(tm=512, tf=256, wbuf=2, vmem_cap=vmem_cap)
    # v6e and default.
    return dict(tm=512, tf=512, wbuf=2, vmem_cap=vmem_cap)


def _mlp_kernel(x_ref, w1_ref, b1_ref, w2t_ref, o_ref, acc_ref, *, tf):
    # x_ref  : [tm, H]  token tile (bf16)
    # w1_ref : [tf, H]  tile of dense_h_to_4h.weight (native [F, H] layout, bf16)
    # b1_ref : [1, F]   full dense_h_to_4h.bias, resident (f32)
    # w2t_ref: [tf, H]  tile of dense_4h_to_h.weight pre-transposed to [F, H] (bf16)
    # o_ref  : [tm, H]  output tile
    # acc_ref: [tm, H]  f32 accumulator scratch, resident across the F reduction axis
    j = pl.program_id(1)

    @pl.when(j == 0)
    def _():
        acc_ref[...] = jnp.zeros_like(acc_ref)

    # First projection for this F-tile:  x @ W1_tile.T -> [tm, tf], f32 accumulation.
    y = lax.dot_general(
        x_ref[...], w1_ref[...],
        dimension_numbers=(((1,), (1,)), ((), ())),
        preferred_element_type=jnp.float32)

    # Fused bias + tanh-approx GeLU, f32 (tanh goes to the EUP slot, overlaps MXU).
    b = b1_ref[:, pl.ds(pl.multiple_of(j * tf, tf), tf)]
    t = y + b
    g = t * 0.5 * (1.0 + jnp.tanh(0.79788456 * t * (1.0 + 0.044715 * t * t)))

    # Second projection partial sum:  g @ W2T_tile -> [tm, H], accumulated in f32.
    acc_ref[...] += jnp.dot(g.astype(w2t_ref.dtype), w2t_ref[...],
                            preferred_element_type=jnp.float32)

    @pl.when(j == pl.num_programs(1) - 1)
    def _():
        o_ref[...] = acc_ref[...].astype(o_ref.dtype)


def prepare_mlp_params(w1, b1, w2, b2, *, compute_dtype=jnp.bfloat16):
    """ONE-TIME parameter prep (do at load time, not per forward call):
       cast weights to the compute dtype and transpose W2 to [F, H] so every
       streamed weight tile is a fully contiguous DMA."""
    F, H = w1.shape
    assert w2.shape == (H, F) and b1.shape == (F,) and b2.shape == (H,)
    # TODO(synk): on v7x, evaluate fp8 storage for w1/w2t to halve weight HBM traffic.
    return dict(
        w1=jnp.asarray(w1, dtype=compute_dtype),                   # [F, H]
        w2t=jnp.asarray(jnp.transpose(w2), dtype=compute_dtype),   # [F, H]
        b1=jnp.asarray(b1, dtype=jnp.float32).reshape(1, F),
        b2=jnp.asarray(b2),
    )


def parallel_mlp_forward(hidden_states, params, *, tm=None, tf=None):
    """hidden_states: [S, B, H]; params from prepare_mlp_params.

    Returns (output [S, B, H], output_bias [H]) exactly like ParallelMLP.forward
    (skip_bias_add=True on the second linear, so b2 is returned, not added)."""
    S, B, H = hidden_states.shape
    w1, w2t, b1, b2 = params["w1"], params["w2t"], params["b1"], params["b2"]
    F = w1.shape[0]
    assert w1.shape == (F, H) and w2t.shape == (F, H)
    assert b1.shape == (1, F) and b2.shape == (H,)

    cfg = _chip_config()
    compute_dtype = w1.dtype
    out_dtype = hidden_states.dtype
    M = S * B

    tm = cfg["tm"] if tm is None else tm
    tf = cfg["tf"] if tf is None else tf
    # bf16 sublane packing: keep tm a multiple of 16, clamped to the problem size.
    tm = max(16, min(_round_up(tm, 16), _round_up(M, 16)))
    tf = _pick_tf(F, tf)

    cb = jnp.dtype(compute_dtype).itemsize
    ob = jnp.dtype(out_dtype).itemsize
    wbuf = cfg["wbuf"]

    def vmem_est(tm_, tf_):
        return (2 * tm_ * H * cb                  # x tiles (double buffered)
                + wbuf * tf_ * H * cb * 2         # W1 + W2T weight tiles
                + 2 * F * 4                       # resident b1 block
                + 2 * tm_ * H * ob                # out tiles
                + tm_ * H * 4                     # f32 accumulator scratch
                + 4 * tm_ * tf_ * 4)              # f32 gelu temporaries (y, t, g, cast)

    # Shrink tiles until the working set fits ~65% of physical VMEM
    # (tf first: it only affects MXU K-granularity, not arithmetic intensity).
    while vmem_est(tm, tf) > 0.65 * cfg["vmem_cap"]:
        if tf > 256 and F % (tf // 2) == 0:
            tf //= 2
        elif tm > 64:
            tm = max(64, _round_up(tm // 2, 16))
        else:
            break

    M_pad = _round_up(M, tm)
    x2d = hidden_states.reshape(M, H)
    if x2d.dtype != compute_dtype:
        x2d = x2d.astype(compute_dtype)
    if M_pad != M:
        # XLA fuses this pad with the cast above (elementwise); weights never repacked.
        x2d = jnp.pad(x2d, ((0, M_pad - M), (0, 0)))

    grid = (M_pad // tm, F // tf)
    vmem_limit = int(min(0.75 * cfg["vmem_cap"],
                         max(1.5 * vmem_est(tm, tf), 32 * 1024 * 1024)))

    w_kwargs = {} if wbuf == 2 else {"pipeline_mode": pl.Buffered(wbuf)}
    w1_spec = pl.BlockSpec((tf, H), lambda i, j: (j, 0), **w_kwargs)
    w2_spec = pl.BlockSpec((tf, H), lambda i, j: (j, 0), **w_kwargs)

    out2d = pl.pallas_call(
        functools.partial(_mlp_kernel, tf=tf),
        out_shape=jax.ShapeDtypeStruct((M_pad, H), out_dtype),
        grid_spec=pltpu.PrefetchScalarGridSpec(
            num_scalar_prefetch=0,
            grid=grid,
            in_specs=[
                pl.BlockSpec((tm, H), lambda i, j: (i, 0)),   # x token tile
                w1_spec,                                      # W1 tile, streams over F
                pl.BlockSpec((1, F), lambda i, j: (0, 0)),    # b1, single resident block
                w2_spec,                                      # W2T tile, streams over F
            ],
            out_specs=pl.BlockSpec((tm, H), lambda i, j: (i, 0)),
            scratch_shapes=[pltpu.VMEM((tm, H), jnp.float32)],
        ),
        compiler_params=pltpu.CompilerParams(
            dimension_semantics=("parallel", "arbitrary"),
            vmem_limit_bytes=vmem_limit),
    )(x2d, w1, b1, w2t)

    out = out2d[:M].reshape(S, B, H)
    # TODO(synk): on v7x decode (single token tile) split the F reduction across the
    # two TensorCores via core_map + per-core partial accumulators for ~2x latency.
    return out, b2


def _reference(hidden_states, w1, b1, w2, b2):
    y = jnp.einsum("sbh,fh->sbf", hidden_states, w1) + b1
    g = y * 0.5 * (1.0 + jnp.tanh(0.79788456 * y * (1.0 + 0.044715 * y * y)))
    out = jnp.einsum("sbf,hf->sbh", g, w2)
    return out, b2


if __name__ == "__main__":
    # Small Megatron-like config: seq=8, batch=2, hidden=128, ffn_hidden=4*hidden=512
    S, B, H = 8, 2, 128
    F = 4 * H
    sigma = 0.02

    key = jax.random.PRNGKey(0)
    k_x, k_w1, k_b1, k_w2, k_b2 = jax.random.split(key, 5)

    hidden_states = jax.random.normal(k_x, (S, B, H), dtype=jnp.float32)
    # init_method_normal(sigma) for weights; biases drawn small-normal so the
    # bias+gelu fusion is exercised non-trivially (synthetic init, no checkpoint).
    w1 = sigma * jax.random.normal(k_w1, (F, H), dtype=jnp.float32)   # dense_h_to_4h.weight
    b1 = 0.1 * jax.random.normal(k_b1, (F,), dtype=jnp.float32)       # dense_h_to_4h.bias
    w2 = sigma * jax.random.normal(k_w2, (H, F), dtype=jnp.float32)   # dense_4h_to_h.weight
    b2 = 0.1 * jax.random.normal(k_b2, (H,), dtype=jnp.float32)       # dense_4h_to_h.bias

    # One-time prep (bf16 cast + W2 transpose) -- mirrors parameter-load time.
    params = prepare_mlp_params(w1, b1, w2, b2)
    jax.block_until_ready(params["w1"])

    out, out_bias = parallel_mlp_forward(hidden_states, params)
    jax.block_until_ready(out)
    jax.block_until_ready(out_bias)

    ref_out, ref_bias = _reference(hidden_states, w1, b1, w2, b2)
    assert out.shape == (S, B, H) and out_bias.shape == (H,)
    # bf16 matmul operands with f32 accumulation -> relaxed tolerance vs f32 reference.
    assert jnp.allclose(out, ref_out, atol=2e-2, rtol=2e-2), float(
        jnp.max(jnp.abs(out - ref_out)))
    assert jnp.allclose(out_bias, ref_bias)

    print("KERNEL_OK")
</pallas_src>

<mosaic_0001>
module attributes {stable_mosaic.version = 11 : i64} {
  func.func @_mlp_kernel(%arg0: i32, %arg1: i32, %arg2: memref<16x128xbf16, #tpu.memory_space<vmem>>, %arg3: memref<512x128xbf16, #tpu.memory_space<vmem>>, %arg4: memref<1x512xf32, #tpu.memory_space<vmem>>, %arg5: memref<512x128xbf16, #tpu.memory_space<vmem>>, %arg6: memref<16x128xf32, #tpu.memory_space<vmem>>, %arg7: memref<16x128xf32, #tpu.memory_space<vmem>>) attributes {dimension_semantics = [#tpu.dimension_semantics<parallel>, #tpu.dimension_semantics<arbitrary>], iteration_bounds = array<i64: 1, 1>, scalar_prefetch = 0 : i64, scratch_operands = 1 : i64, tpu.core_type = #tpu.core_type<tc>, window_params = [{transform_indices = @transform_0, window_bounds = array<i64: 16, 128>}, {transform_indices = @transform_1, window_bounds = array<i64: 512, 128>}, {pipeline_mode = #tpu.pipeline_mode<synchronous>, transform_indices = @transform_2, window_bounds = array<i64: 1, 512>}, {transform_indices = @transform_3, window_bounds = array<i64: 512, 128>}, {transform_indices = @transform_4, window_bounds = array<i64: 16, 128>}]} {
    %c0_i32 = arith.constant 0 : i32
    %0 = arith.cmpi eq, %arg1, %c0_i32 : i32
    %1 = arith.extui %0 : i1 to i32
    %c0_i32_0 = arith.constant 0 : i32
    %2 = arith.cmpi ne, %1, %c0_i32_0 : i32
    scf.if %2 {
      %cst_19 = arith.constant 0.000000e+00 : f32
      %35 = vector.broadcast %cst_19 : f32 to vector<16x128xf32>
      %c0_20 = arith.constant 0 : index
      %c0_21 = arith.constant 0 : index
      %36 = vector.load %arg7[%c0_20, %c0_21] : memref<16x128xf32, #tpu.memory_space<vmem>>, vector<16x128xf32>
      tpu.vector_store %arg7[%c0_20, %c0_21], %35 {strides = array<i32>} : memref<16x128xf32, #tpu.memory_space<vmem>>, vector<16x128xf32>,
    } else {
    }
    %c0 = arith.constant 0 : index
    %c0_1 = arith.constant 0 : index
    %3 = vector.load %arg2[%c0, %c0_1] : memref<16x128xbf16, #tpu.memory_space<vmem>>, vector<16x128xbf16>
    %c0_2 = arith.constant 0 : index
    %c0_3 = arith.constant 0 : index
    %4 = vector.load %arg3[%c0_2, %c0_3] : memref<512x128xbf16, #tpu.memory_space<vmem>>, vector<512x128xbf16>
    %cst = arith.constant dense<0.000000e+00> : vector<16x512xf32>
    %5 = tpu.matmul %3, %4, %cst {dimension_numbers = #tpu.dot_dimension_numbers<[1], [1], [0], [0], [0, 0, 1, 0], [], []>} : vector<16x128xbf16>, vector<512x128xbf16>, vector<16x512xf32> -> vector<16x512xf32>
    %c512_i32 = arith.constant 512 : i32
    %6 = arith.muli %arg1, %c512_i32 : i32
    %7 = tpu.assume_multiple %6, 512 : i32
    %c0_4 = arith.constant 0 : index
    %8 = arith.index_cast %7 : i32 to index
    %9 = vector.load %arg4[%c0_4, %8] : memref<1x512xf32, #tpu.memory_space<vmem>>, vector<1x512xf32>
    %10 = vector.broadcast %9 : vector<1x512xf32> to vector<16x512xf32>
    %11 = arith.addf %5, %10 : vector<16x512xf32>
    %cst_5 = arith.constant 5.000000e-01 : f32
    %12 = vector.broadcast %cst_5 : f32 to vector<16x512xf32>
    %13 = arith.mulf %11, %12 : vector<16x512xf32>
    %cst_6 = arith.constant 0.797884583 : f32
    %14 = vector.broadcast %cst_6 : f32 to vector<16x512xf32>
    %15 = arith.mulf %14, %11 : vector<16x512xf32>
    %cst_7 = arith.constant 4.471500e-02 : f32
    %16 = vector.broadcast %cst_7 : f32 to vector<16x512xf32>
    %17 = arith.mulf %16, %11 : vector<16x512xf32>
    %18 = arith.mulf %17, %11 : vector<16x512xf32>
    %cst_8 = arith.constant 1.000000e+00 : f32
    %19 = vector.broadcast %cst_8 : f32 to vector<16x512xf32>
    %20 = arith.addf %19, %18 : vector<16x512xf32>
    %21 = arith.mulf %15, %20 : vector<16x512xf32>
    %22 = math.tanh %21 : vector<16x512xf32>
    %cst_9 = arith.constant 1.000000e+00 : f32
    %23 = vector.broadcast %cst_9 : f32 to vector<16x512xf32>
    %24 = arith.addf %23, %22 : vector<16x512xf32>
    %25 = arith.mulf %13, %24 : vector<16x512xf32>
    %c0_10 = arith.constant 0 : index
    %c0_11 = arith.constant 0 : index
    %26 = vector.load %arg7[%c0_10, %c0_11] : memref<16x128xf32, #tpu.memory_space<vmem>>, vector<16x128xf32>
    %27 = arith.truncf %25 : vector<16x512xf32> to vector<16x512xbf16>
    %c0_12 = arith.constant 0 : index
    %c0_13 = arith.constant 0 : index
    %28 = vector.load %arg5[%c0_12, %c0_13] : memref<512x128xbf16, #tpu.memory_space<vmem>>, vector<512x128xbf16>
    %cst_14 = arith.constant dense<0.000000e+00> : vector<16x128xf32>
    %29 = tpu.matmul %27, %28, %cst_14 {dimension_numbers = #tpu.dot_dimension_numbers<[1], [0], [0], [1], [0, 0, 1, 1], [], []>} : vector<16x512xbf16>, vector<512x128xbf16>, vector<16x128xf32> -> vector<16x128xf32>
    %30 = arith.addf %26, %29 : vector<16x128xf32>
    %c0_15 = arith.constant 0 : index
    %c0_16 = arith.constant 0 : index
    %31 = vector.load %arg7[%c0_15, %c0_16] : memref<16x128xf32, #tpu.memory_space<vmem>>, vector<16x128xf32>
    tpu.vector_store %arg7[%c0_15, %c0_16], %30 {strides = array<i32>} : memref<16x128xf32, #tpu.memory_space<vmem>>, vector<16x128xf32>,
    %c0_i32_17 = arith.constant 0 : i32
    %32 = arith.cmpi eq, %arg1, %c0_i32_17 : i32
    %33 = arith.extui %32 : i1 to i32
    %c0_i32_18 = arith.constant 0 : i32
    %34 = arith.cmpi ne, %33, %c0_i32_18 : i32
    scf.if %34 {
      %c0_19 = arith.constant 0 : index
      %c0_20 = arith.constant 0 : index
      %35 = vector.load %arg7[%c0_19, %c0_20] : memref<16x128xf32, #tpu.memory_space<vmem>>, vector<16x128xf32>
      %c0_21 = arith.constant 0 : index
      %c0_22 = arith.constant 0 : index
      %36 = vector.load %arg6[%c0_21, %c0_22] : memref<16x128xf32, #tpu.memory_space<vmem>>, vector<16x128xf32>
      tpu.vector_store %arg6[%c0_21, %c0_22], %35 {strides = array<i32>} : memref<16x128xf32, #tpu.memory_space<vmem>>, vector<16x128xf32>,
    } else {
    }
    return
  }
  func.func @transform_0(%arg0: i32, %arg1: i32) -> (i32, i32) {
    %c0_i32 = arith.constant 0 : i32
    %c0_i32_0 = arith.constant 0 : i32
    return %arg0, %c0_i32 : i32, i32
  }
  func.func @transform_1(%arg0: i32, %arg1: i32) -> (i32, i32) {
    %c0_i32 = arith.constant 0 : i32
    %c0_i32_0 = arith.constant 0 : i32
    return %arg1, %c0_i32 : i32, i32
  }
  func.func @transform_2(%arg0: i32, %arg1: i32) -> (i32, i32) {
    %c0_i32 = arith.constant 0 : i32
    %c0_i32_0 = arith.constant 0 : i32
    %c0_i32_1 = arith.constant 0 : i32
    return %c0_i32, %c0_i32_0 : i32, i32
  }
  func.func @transform_3(%arg0: i32, %arg1: i32) -> (i32, i32) {
    %c0_i32 = arith.constant 0 : i32
    %c0_i32_0 = arith.constant 0 : i32
    return %arg1, %c0_i32 : i32, i32
  }
  func.func @transform_4(%arg0: i32, %arg1: i32) -> (i32, i32) {
    %c0_i32 = arith.constant 0 : i32
    %c0_i32_0 = arith.constant 0 : i32
    return %arg0, %c0_i32 : i32, i32
  }
}

</mosaic_0001>

<bundles_post_ra>
// kernel: tpu_custom_call.1
= control target key start
LH: loop header
LB: loop body
LE: loop exit
PB: predicated region body
PF: predicated region fallthrough
CT: control target
= control target key end

     0   :  { %9 = vsyncpa [#allocation4], 0  ;;  %s1340_s0 = inlined_call_operand.hbm [shape: bf16[16,128], index: 0, kind: input, shape index: {}]   ;;  %s1341_s1 = inlined_call_operand.hbm [shape: bf16[512,128], index: 1, kind: input, shape index: {}]   ;;  %s1342_s2 = inlined_call_operand.vmem [shape: f32[1,512], index: 2, kind: input, shape index: {}]   ;;  %s1343_s3 = inlined_call_operand.hbm [shape: bf16[512,128], index: 3, kind: input, shape index: {}]   ;;  %s1344_s4 = inlined_call_operand.hbm [shape: f32[16,128], index: 4, kind: output, shape index: {}]  }
   0x1   :  { %10 = vsyncpa [#allocation7], 0 }
   0x2   :  { %11 = vsyncpa [#allocation5], 0  ;;  %s1216_s15 = smov [#allocation6]   ;;  %s1217_s17 = smov [#allocation3]  }
   0x3   :  { %s29_s16 = sshll.u32 %s1216_s15, 4  ;;  %s17_s18 = sshll.u32 %s1217_s17, 4  ;;  %s30_s16 = int_to_ptr.vmem [resolvable:$true] %s29_s16  ;;  %s1249_s18 = int_to_ptr.vmem [resolvable:$true] %s17_s18 }
   0x4   :  { %s1122_s21 = scalar_lea.hbm %s1341_s1, 4096 }
   0x5   :  { %p1123_p0 = scmp.ne.s32.totalorder %s1341_s1, %s1122_s21  ;;  %p1126_p1 = scmp.lt.u32.totalorder %s1122_s21, %s1341_s1 }
   0x7   :  { %p1128_p2 = pnand %p1126_p1, %p1123_p0 }
   0x9   :  { %1131 = shalt.err (!%p1128_p2)
}
   0xa   :  { %s1132_s26 = scalar_lea.vmem %s30_s16, 4096  ;;  %p1137_p4 = scmp.lt.s32.totalorder %s30_s16, %s30_s16 }
   0xb   :  { %p1133_p3 = scmp.ne.s32.totalorder %s30_s16, %s1132_s26  ;;  %p1138_p5 = scmp.lt.s32.totalorder %s1132_s26, %s1132_s26 }
   0xd   :  { %p1139_p6 = por %p1138_p5, %p1137_p4 }
   0xf   :  { %p1140_p7 = pnand %p1139_p6, %p1133_p3 }
  0x11   :  { %1143 = shalt.err (!%p1140_p7)
}
  0x12   :  { %s1218_s27 = smov 64   ;;  %s1219_s28 = smov 4  }
  0x13   :  { %35 = dma.hbm_to_vmem [thread:$0]  %s1341_s1, 4096, %s30_s16, [#allocation7], %s1218_s27, %s1218_s27, %s1219_s28  }
  0x14   :  { %s1144_s7 = scalar_lea.hbm %s1340_s0, 128 }
  0x15   :  { %p1145_p8 = scmp.ne.s32.totalorder %s1340_s0, %s1144_s7  ;;  %p1148_p9 = scmp.lt.u32.totalorder %s1144_s7, %s1340_s0 }
  0x17   :  { %p1150_p10 = pnand %p1148_p9, %p1145_p8 }
  0x19   :  { %1153 = shalt.err (!%p1150_p10)
}
  0x1a   :  { %s1154_s12 = scalar_lea.vmem %s1249_s18, 128  ;;  %p1159_p12 = scmp.lt.s32.totalorder %s1249_s18, %s1249_s18 }
  0x1b   :  { %p1155_p11 = scmp.ne.s32.totalorder %s1249_s18, %s1154_s12  ;;  %p1160_p13 = scmp.lt.s32.totalorder %s1154_s12, %s1154_s12 }
  0x1d   :  { %p1161_p0 = por %p1160_p13, %p1159_p12 }
  0x1f   :  { %p1162_p1 = pnand %p1161_p0, %p1155_p11 }
  0x21   :  { %1165 = shalt.err (!%p1162_p1)
}
  0x22   :  { %23 = dma.hbm_to_vmem [thread:$0]  %s1340_s0, 128, %s1249_s18, [#allocation4], %s1218_s27, %s1218_s27, %s1219_s28  }
  0x23   :  { %s1220_s14 = smov [#allocation8]   ;;  %s1166_s19 = scalar_lea.hbm %s1343_s3, 4096 }
  0x24   :  { %s43_s15 = sshll.u32 %s1220_s14, 4  ;;  %p1167_p2 = scmp.ne.s32.totalorder %s1343_s3, %s1166_s19  ;;  %s44_s15 = int_to_ptr.vmem [resolvable:$true] %s43_s15 }
  0x25   :  { %p1170_p3 = scmp.lt.u32.totalorder %s1166_s19, %s1343_s3 }
  0x27   :  { %p1172_p4 = pnand %p1170_p3, %p1167_p2 }
  0x29   :  { %1175 = shalt.err (!%p1172_p4)
}
  0x2a   :  { %s1176_s24 = scalar_lea.vmem %s44_s15, 4096  ;;  %p1181_p6 = scmp.lt.s32.totalorder %s44_s15, %s44_s15 }
  0x2b   :  { %p1177_p5 = scmp.ne.s32.totalorder %s44_s15, %s1176_s24  ;;  %p1182_p7 = scmp.lt.s32.totalorder %s1176_s24, %s1176_s24 }
  0x2d   :  { %p1183_p8 = por %p1182_p7, %p1181_p6 }
  0x2f   :  { %p1184_p9 = pnand %p1183_p8, %p1177_p5 }
  0x31   :  { %1187 = shalt.err (!%p1184_p9)
}
  0x32   :  { %49 = dma.hbm_to_vmem [thread:$0]  %s1343_s3, 4096, %s44_s15, [#allocation7], %s1218_s27, %s1218_s27, %s1219_s28  }
  0x33   :  { %1210 = dma.done.wait [#allocation4], 128  }
  0x34   :  { %1211 = vsyncadd [#allocation4], 4294967168 }
  0x35   :  { %1212 = dma.done.wait [#allocation7], 8192  }
  0x36   :  { %1213 = vsyncadd [#allocation7], 4294959104  ;;  %v1041_v0 = vld [vmem:[#allocation6 + $0x40] sm:$0xff]   ;;  %v1045_v4 = vld [vmem:[#allocation6 + $0x48] sm:$0xff]  }
  0x37   :  { %v1042_v1 = vld [vmem:[#allocation6 + $0xc0] sm:$0xff]   ;;  %953 = vmatprep.subr.bf16.mxu0 %v1041_v0  ;;  %v1046_v5 = vld [vmem:[#allocation6 + $0xc8] sm:$0xff]   ;;  %v1049_v8 = vld [vmem:[#allocation6 + $0x50] sm:$0xff]  }
  0x38   :  { %v1043_v2 = vld [vmem:[#allocation6] sm:$0xff]   ;;  %971 = vmatprep.subr.bf16.mxu1 %v1042_v1  ;;  %v1047_v6 = vld [vmem:[#allocation6 + $0x8] sm:$0xff]   ;;  %v1050_v9 = vld [vmem:[#allocation6 + $0xd0] sm:$0xff]   ;;  %v138_v1 = vlaneseq }
  0x39   :  { %v1044_v3 = vld [vmem:[#allocation6 + $0x80] sm:$0xff]   ;;  %954 = vmatpush3.bf16.xpose.msra.mxu0 %v1043_v2  ;;  %v1048_v7 = vld [vmem:[#allocation6 + $0x88] sm:$0xff]   ;;  %v1051_v10 = vld [vmem:[#allocation6 + $0x10] sm:$0xff]  }
  0x3a   :  { %972 = vmatpush3.bf16.xpose.msra.mxu1 %v1044_v3  ;;  %955 = vmatprep.subr.bf16.mxu0 %v1045_v4  ;;  %v1052_v11 = vld [vmem:[#allocation6 + $0x90] sm:$0xff]   ;;  %v1053_v12 = vld [vmem:[#allocation6 + $0x58] sm:$0xff]   ;;  %v1057_v16 = vld [vmem:[#allocation6 + $0x60] sm:$0xff]   ;;  %v139_v2 = vshrl.u32 %v138_v1, 7 }
  0x3b   :  { %973 = vmatprep.subr.bf16.mxu1 %v1046_v5  ;;  %v1054_v13 = vld [vmem:[#allocation6 + $0xd8] sm:$0xff]   ;;  %v1058_v17 = vld [vmem:[#allocation6 + $0xe0] sm:$0xff]   ;;  %v1061_v20 = vld [vmem:[#allocation6 + $0x68] sm:$0xff]  }
  0x3c   :  { %v1055_v14 = vld [vmem:[#allocation6 + $0x18] sm:$0xff]   ;;  %v1059_v18 = vld [vmem:[#allocation6 + $0x20] sm:$0xff]   ;;  %v1062_v22 = vld [vmem:[#allocation6 + $0xe8] sm:$0xff]   ;;  %v140_v3 = vsub.s32 0, %v139_v2  ;;  %v148_v5 = vsub.s32 2, %v139_v2 }
  0x3d   :  { %v1056_v15 = vld [vmem:[#allocation6 + $0x98] sm:$0xff]   ;;  %v1060_v19 = vld [vmem:[#allocation6 + $0xa0] sm:$0xff]   ;;  %v1063_v23 = vld [vmem:[#allocation6 + $0x28] sm:$0xff]  }
  0x3e   :  { %v1073_v21 = vld [vmem:[#allocation3] sm:$0xff]   ;;  %v1064_v24 = vld [vmem:[#allocation6 + $0xa8] sm:$0xff]   ;;  %v1065_v25 = vld [vmem:[#allocation6 + $0x70] sm:$0xff]  }
  0x3f   :  { %969 = vmatprep.mubr.bf16.mxu0 %v1073_v21  ;;  %987 = vmatprep.mubr.bf16.mxu1 %v1073_v21  ;;  %v1066_v26 = vld [vmem:[#allocation6 + $0xf0] sm:$0xff]   ;;  %v1069_v29 = vld [vmem:[#allocation6 + $0x78] sm:$0xff]   ;;  %v1074_v33 = vld [vmem:[#allocation8 + $0x40] sm:$0xff]  }
  0x40   :  { %v1067_v27 = vld [vmem:[#allocation6 + $0x30] sm:$0xff]   ;;  %v1070_v30 = vld [vmem:[#allocation6 + $0xf8] sm:$0xff]   ;;  %v1075_v34 = vld [vmem:[#allocation8 + $0xc0] sm:$0xff]  }
  0x41   :  { %956 = vmatpush3.bf16.xpose.msra.mxu0 %v1047_v6  ;;  %v1068_v28 = vld [vmem:[#allocation6 + $0xb0] sm:$0xff]   ;;  %v1071_v31 = vld [vmem:[#allocation6 + $0x38] sm:$0xff]   ;;  %v1076_v35 = vld [vmem:[#allocation8] sm:$0xff]   ;;  %v144_v6 = vsub.s32 1, %v139_v2 }
  0x42   :  { %974 = vmatpush3.bf16.xpose.msra.mxu1 %v1048_v7  ;;  %957 = vmatprep.subr.bf16.mxu0 %v1049_v8  ;;  %v1072_v32 = vld [vmem:[#allocation6 + $0xb8] sm:$0xff]   ;;  %v1077_v36 = vld [vmem:[#allocation8 + $0x80] sm:$0xff]   ;;  %v1078_v37 = vld [vmem:[#allocation8 + $0x48] sm:$0xff]   ;;  %v152_v7 = vsub.s32 3, %v139_v2 }
  0x43   :  { %975 = vmatprep.subr.bf16.mxu1 %v1050_v9  ;;  %v1079_v38 = vld [vmem:[#allocation8 + $0xc8] sm:$0xff]   ;;  %v1082_v41 = vld [vmem:[#allocation8 + $0x50] sm:$0xff]   ;;  %v1086_v45 = vld [vmem:[#allocation8 + $0x58] sm:$0xff]  }
  0x44   :  { %v1080_v39 = vld [vmem:[#allocation8 + $0x8] sm:$0xff]   ;;  %v1083_v42 = vld [vmem:[#allocation8 + $0xd0] sm:$0xff]   ;;  %v1087_v46 = vld [vmem:[#allocation8 + $0xd8] sm:$0xff]  }
  0x45   :  { %v1081_v40 = vld [vmem:[#allocation8 + $0x88] sm:$0xff]   ;;  %v1084_v43 = vld [vmem:[#allocation8 + $0x10] sm:$0xff]   ;;  %v1088_v47 = vld [vmem:[#allocation8 + $0x18] sm:$0xff]  }
  0x46   :  { %v1085_v44 = vld [vmem:[#allocation8 + $0x90] sm:$0xff]   ;;  %v1089_v48 = vld [vmem:[#allocation8 + $0x98] sm:$0xff]   ;;  %v1090_v49 = vld [vmem:[#allocation8 + $0x60] sm:$0xff]  }
  0x47   :  { %v1091_v50 = vld [vmem:[#allocation8 + $0xe0] sm:$0xff]   ;;  %v1094_v53 = vld [vmem:[#allocation8 + $0x68] sm:$0xff]   ;;  %v1098_v57 = vld [vmem:[#allocation8 + $0x70] sm:$0xff]  }
  0x48   :  { %v1092_v51 = vld [vmem:[#allocation8 + $0x20] sm:$0xff]   ;;  %v1095_v54 = vld [vmem:[#allocation8 + $0xe8] sm:$0xff]   ;;  %v1099_v58 = vld [vmem:[#allocation8 + $0xf0] sm:$0xff]  }
  0x49   :  { %958 = vmatpush3.bf16.xpose.msra.mxu0 %v1051_v10  ;;  %v1093_v52 = vld [vmem:[#allocation8 + $0xa0] sm:$0xff]   ;;  %v1096_v55 = vld [vmem:[#allocation8 + $0x28] sm:$0xff]   ;;  %v1100_v59 = vld [vmem:[#allocation8 + $0x30] sm:$0xff]  }
  0x4a   :  { %976 = vmatpush3.bf16.xpose.msra.mxu1 %v1052_v11  ;;  %959 = vmatprep.subr.bf16.mxu0 %v1053_v12  ;;  %v1097_v56 = vld [vmem:[#allocation8 + $0xa8] sm:$0xff]   ;;  %v1101_v60 = vld [vmem:[#allocation8 + $0xb0] sm:$0xff]   ;;  %v1102_v61 = vld [vmem:[#allocation8 + $0x78] sm:$0xff]  }
  0x4b   :  { %977 = vmatprep.subr.bf16.mxu1 %v1054_v13  ;;  %v1103_v62 = vld [vmem:[#allocation8 + $0xf8] sm:$0xff]  }
  0x4c   :  { %v1104_v63 = vld [vmem:[#allocation8 + $0x38] sm:$0xff]  }
  0x4d   :  { %v1105_v0 = vld [vmem:[#allocation8 + $0xb8] sm:$0xff]  }
  0x4e   :  { %v136_v4 = vld [vmem:[%s1342_s2] sm:$0xf]  ;;  %s1221_s2 = smov [#allocation9]  }
  0x4f   :  { %v141_v8 = vrot.slane %v136_v4, %v140_v3  ;;  %v149_v9 = vrot.slane %v136_v4, %v148_v5  ;;  %v145_v10 = vrot.slane %v136_v4, %v144_v6  ;;  %v153_v11 = vrot.slane %v136_v4, %v152_v7  ;;  %s874_s26 = sshll.u32 %s1221_s2, 4  ;;  %s875_s26 = int_to_ptr.vmem [resolvable:$true] %s874_s26 }
  0x50   :  { %s1188_s27 = scalar_lea.vmem %s875_s26, 256  ;;  %p1193_p11 = scmp.lt.s32.totalorder %s875_s26, %s875_s26 }
  0x51   :  { %960 = vmatpush3.bf16.xpose.msra.mxu0 %v1055_v14  ;;  %p1189_p10 = scmp.ne.s32.totalorder %s875_s26, %s1188_s27  ;;  %p1194_p12 = scmp.lt.s32.totalorder %s1188_s27, %s1188_s27 }
  0x52   :  { %978 = vmatpush3.bf16.xpose.msra.mxu1 %v1056_v15  ;;  %961 = vmatprep.subr.bf16.mxu0 %v1057_v16 }
  0x53   :  { %979 = vmatprep.subr.bf16.mxu1 %v1058_v17  ;;  %p1195_p13 = por %p1194_p12, %p1193_p11 }
  0x55   :  { %p1196_p0 = pnand %p1195_p13, %p1189_p10 }
  0x59   :  { %962 = vmatpush3.bf16.xpose.msra.mxu0 %v1059_v18 }
  0x5a   :  { %980 = vmatpush3.bf16.xpose.msra.mxu1 %v1060_v19  ;;  %963 = vmatprep.subr.bf16.mxu0 %v1061_v20 }
  0x5b   :  { %981 = vmatprep.subr.bf16.mxu1 %v1062_v22 }
  0x61   :  { %964 = vmatpush3.bf16.xpose.msra.mxu0 %v1063_v23 }
  0x62   :  { %982 = vmatpush3.bf16.xpose.msra.mxu1 %v1064_v24  ;;  %965 = vmatprep.subr.bf16.mxu0 %v1065_v25 }
  0x63   :  { %983 = vmatprep.subr.bf16.mxu1 %v1066_v26 }
  0x69   :  { %966 = vmatpush3.bf16.xpose.msra.mxu0 %v1067_v27 }
  0x6a   :  { %984 = vmatpush3.bf16.xpose.msra.mxu1 %v1068_v28  ;;  %967 = vmatprep.subr.bf16.mxu0 %v1069_v29 }
  0x6b   :  { %985 = vmatprep.subr.bf16.mxu1 %v1070_v30 }
  0x71   :  { %968 = vmatpush3.bf16.xpose.msra.mxu0 %v1071_v31 }
  0x72   :  { %986 = vmatpush3.bf16.xpose.msra.mxu1 %v1072_v32  ;;  %989 = vmatprep.subr.bf16.mxu0 %v1074_v33 }
  0x73   :  { %1011 = vmatprep.subr.bf16.mxu1 %v1075_v34 }
  0x78   :  { %970 = vmatmul.mubr.bf16.vlgmr.msra.gmra.mrb[0].mxu0 %v1073_v21 }
  0x79   :  { %988 = vmatmul.mubr.bf16.vlgmr.msra.gmra.mrb[0].mxu1 %v1073_v21  ;;  %990 = vmatpush3.bf16.msra.mxu0 %v1076_v35 }
  0x7a   :  { %1012 = vmatpush3.bf16.msra.mxu1 %v1077_v36  ;;  %991 = vmatprep.subr.bf16.mxu0 %v1078_v37 }
  0x7b   :  { %1013 = vmatprep.subr.bf16.mxu1 %v1079_v38 }
  0x7d   :  { %992 = vmatpush3.bf16.msra.mxu0 %v1080_v39 }
  0x7e   :  { %1014 = vmatpush3.bf16.msra.mxu1 %v1081_v40  ;;  %993 = vmatprep.subr.bf16.mxu0 %v1082_v41 }
  0x7f   :  { %1015 = vmatprep.subr.bf16.mxu1 %v1083_v42 }
  0x81   :  { %994 = vmatpush3.bf16.msra.mxu0 %v1084_v43 }
  0x82   :  { %1016 = vmatpush3.bf16.msra.mxu1 %v1085_v44  ;;  %995 = vmatprep.subr.bf16.mxu0 %v1086_v45 }
  0x83   :  { %1017 = vmatprep.subr.bf16.mxu1 %v1087_v46 }
  0x85   :  { %996 = vmatpush3.bf16.msra.mxu0 %v1088_v47 }
  0x86   :  { %1018 = vmatpush3.bf16.msra.mxu1 %v1089_v48  ;;  %997 = vmatprep.subr.bf16.mxu0 %v1090_v49 }
  0x87   :  { %1019 = vmatprep.subr.bf16.mxu1 %v1091_v50 }
  0x89   :  { %998 = vmatpush3.bf16.msra.mxu0 %v1092_v51 }
  0x8a   :  { %1020 = vmatpush3.bf16.msra.mxu1 %v1093_v52  ;;  %999 = vmatprep.subr.bf16.mxu0 %v1094_v53 }
  0x8b   :  { %1021 = vmatprep.subr.bf16.mxu1 %v1095_v54 }
  0x8d   :  { %1000 = vmatpush3.bf16.msra.mxu0 %v1096_v55 }
  0x8e   :  { %1022 = vmatpush3.bf16.msra.mxu1 %v1097_v56  ;;  %1001 = vmatprep.subr.bf16.mxu0 %v1098_v57 }
  0x8f   :  { %1023 = vmatprep.subr.bf16.mxu1 %v1099_v58 }
  0x91   :  { %1002 = vmatpush3.bf16.msra.mxu0 %v1100_v59 }
  0x92   :  { %1024 = vmatpush3.bf16.msra.mxu1 %v1101_v60  ;;  %1003 = vmatprep.subr.bf16.mxu0 %v1102_v61 }
  0x93   :  { %1025 = vmatprep.subr.bf16.mxu1 %v1103_v62 }
  0x95   :  { %1004 = vmatpush3.bf16.msra.mxu0 %v1104_v63 }
  0x96   :  { %1026 = vmatpush3.bf16.msra.mxu1 %v1105_v0 }
 0x14b   :  { %v390_v12 = vpop.f32.mrb[0].mxu0 }
 0x14c   :  { %v1304_v13 = vadd.f32 %v390_v12, %v141_v8  ;;  %v433_v14 = vpop.f32.mrb[0].mxu1  ;;  %v392_v15 = vpop.f32.mrb[1].mxu0 }
 0x14d   :  { %v1306_v16 = vadd.f32 %v433_v14, %v149_v9  ;;  %v1308_v17 = vadd.f32 %v392_v15, %v145_v10  ;;  %v435_v18 = vpop.f32.mrb[1].mxu1  ;;  %v394_v19 = vpop.f32.mrb[2].mxu0 }
 0x14e   :  { %v458_v20 = vmul.f32 0.044715, %v1304_v13  ;;  %v1311_v21 = vadd.f32 %v435_v18, %v153_v11  ;;  %v437_v22 = vpop.f32.mrb[2].mxu1  ;;  %v395_v24 = vadd.f32 %v394_v19, %v141_v8  ;;  %v396_v25 = vpop.f32.mrb[3].mxu0  ;;  %v450_v28 = vmul.f32 0.7978846, %v1304_v13 }
 0x14f   :  { %v460_v23 = vmul.f32 0.044715, %v1306_v16  ;;  %v459_v27 = vmul.f32 0.044715, %v1308_v17  ;;  %v439_v31 = vpop.f32.mrb[3].mxu1  ;;  %v438_v35 = vadd.f32 %v437_v22, %v149_v9  ;;  %v397_v39 = vadd.f32 %v396_v25, %v145_v10 }
 0x150   :  { %v466_v26 = vmul.f32 %v458_v20, %v1304_v13  ;;  %v461_v30 = vmul.f32 0.044715, %v1311_v21  ;;  %v462_v34 = vmul.f32 0.044715, %v395_v24  ;;  %v452_v36 = vmul.f32 0.7978846, %v1306_v16 }
 0x151   :  { %v468_v29 = vmul.f32 %v460_v23, %v1306_v16  ;;  %v467_v33 = vmul.f32 %v459_v27, %v1308_v17  ;;  %v440_v43 = vadd.f32 %v439_v31, %v153_v11  ;;  %v451_v45 = vmul.f32 0.7978846, %v1308_v17 }
 0x152   :  { %v474_v32 = vadd.f32 1.0, %v466_v26  ;;  %v469_v38 = vmul.f32 %v461_v30, %v1311_v21  ;;  %v470_v42 = vmul.f32 %v462_v34, %v395_v24  ;;  %v464_v47 = vmul.f32 0.044715, %v438_v35 }
 0x153   :  { %v476_v37 = vadd.f32 1.0, %v468_v29  ;;  %v475_v41 = vadd.f32 1.0, %v467_v33  ;;  %v453_v48 = vmul.f32 0.7978846, %v1311_v21  ;;  %v454_v49 = vmul.f32 0.7978846, %v395_v24 }
 0x154   :  { %v482_v40 = vmul.f32 %v474_v32, %v450_v28  ;;  %v477_v46 = vadd.f32 1.0, %v469_v38  ;;  %v478_v50 = vadd.f32 1.0, %v470_v42  ;;  %v472_v52 = vmul.f32 %v464_v47, %v438_v35 }
 0x155   :  { %v484_v44 = vmul.f32 %v476_v37, %v452_v36  ;;  %v483_v51 = vmul.f32 %v475_v41, %v451_v45  ;;  %v463_v53 = vmul.f32 0.044715, %v397_v39  ;;  %v465_v56 = vmul.f32 0.044715, %v440_v43 }
 0x156   :  { %1106 = vtanh.f32 %v482_v40  ;;  %v485_v54 = vmul.f32 %v477_v46, %v453_v48  ;;  %v486_v55 = vmul.f32 %v478_v50, %v454_v49  ;;  %v456_v57 = vmul.f32 0.7978846, %v438_v35 }
 0x157   :  { %1108 = vtanh.f32 %v484_v44  ;;  %v480_v58 = vadd.f32 1.0, %v472_v52  ;;  %v471_v59 = vmul.f32 %v463_v53, %v397_v39  ;;  %v473_v60 = vmul.f32 %v465_v56, %v440_v43 }
 0x158   :  { %1110 = vtanh.f32 %v486_v55  ;;  %v455_v62 = vmul.f32 0.7978846, %v397_v39  ;;  %v457_v0 = vmul.f32 0.7978846, %v440_v43  ;;  %v442_v9 = vmul.f32 0.5, %v1304_v13 }
 0x159   :  { %v488_v61 = vmul.f32 %v480_v58, %v456_v57  ;;  %v479_v63 = vadd.f32 1.0, %v471_v59  ;;  %1112 = vtanh.f32 %v483_v51  ;;  %v481_v1 = vadd.f32 1.0, %v473_v60 }
 0x15a   :  { %1114 = vtanh.f32 %v485_v54  ;;  %v446_v10 = vmul.f32 0.5, %v395_v24  ;;  %v444_v20 = vmul.f32 0.5, %v1306_v16  ;;  %v448_v22 = vmul.f32 0.5, %v438_v35 }
 0x15b   :  { %1116 = vtanh.f32 %v488_v61  ;;  %v487_v2 = vmul.f32 %v479_v63, %v455_v62  ;;  %v489_v3 = vmul.f32 %v481_v1, %v457_v0  ;;  %v443_v27 = vmul.f32 0.5, %v1308_v17 }
 0x15c   :  { %v447_v31 = vmul.f32 0.5, %v397_v39  ;;  %v445_v33 = vmul.f32 0.5, %v1311_v21  ;;  %v449_v34 = vmul.f32 0.5, %v440_v43 }
 0x15d   :  { %1118 = vtanh.f32 %v487_v2 }
 0x15e   :  { %1120 = vtanh.f32 %v489_v3 }
 0x160   :  { %v1107_v4 = vpop.eup %1106 }
 0x161   :  { %v1109_v5 = vpop.eup %1108  ;;  %v498_v6 = vadd.f32 1.0, %v1107_v4 }
 0x162   :  { %v1111_v7 = vpop.eup %1110  ;;  %v500_v14 = vadd.f32 1.0, %v1109_v5 }
 0x163   :  { %v1113_v8 = vpop.eup %1112  ;;  %v502_v11 = vadd.f32 1.0, %v1111_v7  ;;  %v506_v18 = vmul.f32 %v498_v6, %v442_v9 }
 0x164   :  { %v1115_v12 = vpop.eup %1114  ;;  %v499_v23 = vadd.f32 1.0, %v1113_v8  ;;  %v508_v24 = vmul.f32 %v500_v14, %v444_v20 }
 0x165   :  { %v1117_v15 = vpop.eup %1116  ;;  %v510_v19 = vmul.f32 %v502_v11, %v446_v10  ;;  %v501_v28 = vadd.f32 1.0, %v1115_v12 }
 0x166   :  { %v504_v25 = vadd.f32 1.0, %v1117_v15  ;;  %v507_v37 = vmul.f32 %v499_v23, %v443_v27 }
 0x167   :  { %v1119_v26 = vpop.eup %1118  ;;  %v516_v29 = vpack.c.bf16 %v510_v19, %v506_v18  ;;  %v509_v35 = vmul.f32 %v501_v28, %v445_v33 }
 0x168   :  { %v1121_v30 = vpop.eup %1120  ;;  %v503_v13 = vadd.f32 1.0, %v1119_v26  ;;  %v512_v32 = vmul.f32 %v504_v25, %v448_v22 }
 0x169   :  { %v505_v36 = vadd.f32 1.0, %v1121_v30 }
 0x16a   :  { %v511_v38 = vmul.f32 %v503_v13, %v447_v31  ;;  %v518_v16 = vpack.c.bf16 %v512_v32, %v508_v24 }
 0x16b   :  { %v513_v40 = vmul.f32 %v505_v36, %v449_v34 }
 0x16c   :  { %v517_v41 = vpack.c.bf16 %v511_v38, %v507_v37 }
 0x16d   :  { %v519_v42 = vpack.c.bf16 %v513_v40, %v509_v35 }
 0x16e   :  { %808 = vmatprep.mubr.bf16.mxu0 %v517_v41 }
 0x16f   :  { %849 = vmatprep.mubr.bf16.mxu1 %v519_v42  ;;  %809 = vmatmul.mubr.bf16.vlgmr.msra.gmra.mrb[4].mxu0 %v516_v29 }
 0x170   :  { %850 = vmatmul.mubr.bf16.vlgmr.msra.gmra.mrb[4].mxu1 %v518_v16 }
 0x242   :  { %v1005_v17 = vpop.f32.mrb[4].mxu0 }
 0x243   :  { %v1027_v39 = vpop.f32.mrb[4].mxu1  ;;  %v1006_v44 = vpop.f32.mrb[5].mxu0 }
 0x244   :  { %v1007_v45 = vadd.f32 %v1006_v44, %v1005_v17  ;;  %v1028_v46 = vpop.f32.mrb[5].mxu1  ;;  %v1008_v47 = vpop.f32.mrb[6].mxu0 }
 0x245   :  { %v1029_v21 = vadd.f32 %v1028_v46, %v1027_v39  ;;  %v1030_v43 = vpop.f32.mrb[6].mxu1  ;;  %v1009_v48 = vpop.f32.mrb[7].mxu0 }
 0x246   :  { %v1010_v49 = vadd.f32 %v1009_v48, %v1008_v47  ;;  %v1031_v50 = vpop.f32.mrb[7].mxu1 }
 0x247   :  { %v852_v51 = vadd.f32 %v1029_v21, %v1007_v45  ;;  %v1032_v52 = vadd.f32 %v1031_v50, %v1030_v43 }
 0x249   :  { %867 = vst [vmem:[#allocation9] sm:$0xff] %v852_v51  ;;  %v855_v53 = vadd.f32 %v1032_v52, %v1010_v49 }
 0x24b   :  { %868 = vst [vmem:[#allocation9 + $0x8] sm:$0xff] %v855_v53 }
 0x24c   :  { %1199 = shalt.err (!%p1196_p0)
}
 0x24d   :  { %s1200_s30 = scalar_lea.hbm %s1344_s4, 256 }
 0x24e   :  { %p1201_p1 = scmp.ne.s32.totalorder %s1344_s4, %s1200_s30  ;;  %p1204_p2 = scmp.lt.u32.totalorder %s1200_s30, %s1344_s4 }
 0x250   :  { %p1206_p3 = pnand %p1204_p2, %p1201_p1 }
 0x252   :  { %1209 = shalt.err (!%p1206_p3)
}
 0x253   :  { %s1222_s9 = smov 128   ;;  %s1223_s10 = smov 8  }
 0x254   :  { %880 = dma.vmem_to_hbm [thread:$0]  %s875_s26, 256, %s1344_s4, [#allocation5], %s1222_s9, %s1222_s9, %s1223_s10  }
 0x255   :  { %1214 = dma.done.wait [#allocation5], 256  }
 0x256   :  { %1215 = vsyncadd [#allocation5], 4294967040 }
 0x257   :  { %884 = vsyncpa [#allocation4], 1 }
 0x258   :  { %885 = vsyncpa [#allocation7], 1 }
 0x259   :  { %886 = vsyncpa [#allocation5], 1 }

</bundles_post_ra>
